<compile_context>
chip_gen: v7x
topology: tpu7x:2x2x1
jax: 0.10.0
libtpu: 0.0.40
codegen_flags: <defaults>
</compile_context>

<pallas_src>
import functools

import jax
import jax.numpy as jnp
from jax.experimental import pallas as pl
from jax.experimental.pallas import tpu as pltpu


def _round_up(x: int, m: int) -> int:
    return ((x + m - 1) // m) * m


def _cdiv(a: int, b: int) -> int:
    return (a + b - 1) // b


def _sublane_granule(dtype) -> int:
    # Rows per packed vreg tile: f32 -> 8, bf16 -> 16, int8/fp8 -> 32.
    return max(8, 32 // jnp.dtype(dtype).itemsize)


def _vmem_ceiling_bytes() -> int:
    """Per-generation scoped-VMEM budget (v7x has 64 MiB physical per TC)."""
    try:
        kind = jax.devices()[0].device_kind.lower()
    except Exception:
        kind = ""
    if "v7" in kind or "7x" in kind:
        return 48 * 1024 * 1024
    return 100 * 1024 * 1024  # v5e / v6e have 128 MiB physical VMEM


# ---------------------------------------------------------------------------
# Fused 3-layer head kernel: grid over M tiles, weights resident, hidden
# activations in VMEM scratch.
# ---------------------------------------------------------------------------
def _fused_head_kernel(x_ref, w1_ref, b1_ref, w2_ref, b2_ref, w3_ref, b3_ref,
                       o_ref, h1_ref, h2_ref):
    """relu(x@W1+b1) -> relu(.@W2+b2) -> .@W3+b3 for one (tm, F) row tile."""
    h1 = jnp.dot(x_ref[...], w1_ref[...], preferred_element_type=jnp.float32)
    h1_ref[...] = jnp.maximum(h1 + b1_ref[...], 0.0).astype(h1_ref.dtype)

    h2 = jnp.dot(h1_ref[...], w2_ref[...], preferred_element_type=jnp.float32)
    h2_ref[...] = jnp.maximum(h2 + b2_ref[...], 0.0).astype(h2_ref.dtype)

    out = jnp.dot(h2_ref[...], w3_ref[...], preferred_element_type=jnp.float32)
    o_ref[...] = (out + b3_ref[...]).astype(o_ref.dtype)


def _fused_vmem_estimate(tm, dims, compute_dtype, out_dtype):
    f, h1, h2, n_out = dims
    cs = jnp.dtype(compute_dtype).itemsize
    os_ = jnp.dtype(out_dtype).itemsize
    w_bytes = 2 * (f * h1 + h1 * h2 + h2 * n_out) * cs  # (double-buffered) resident weights
    b_bytes = 2 * (h1 + h2 + n_out) * 4                 # resident f32 biases
    x_bytes = 2 * tm * f * cs                           # streamed x tile, double-buffered
    o_bytes = 2 * tm * n_out * os_                      # streamed output tile
    s_bytes = tm * (h1 + h2) * cs                       # hidden-activation scratch
    return w_bytes + b_bytes + x_bytes + o_bytes + s_bytes


def prediction_head_forward(x, params, *, compute_dtype=jnp.bfloat16,
                            out_dtype=None, tm=512):
    """PredictionHead.forward: x -> relu(fc1) -> relu(fc2) -> fc3."""
    w1, b1 = params["w1"], params["b1"]
    w2, b2 = params["w2"], params["b2"]
    w3, b3 = params["w3"], params["b3"]
    f, hid1 = w1.shape
    hid1b, hid2 = w2.shape
    hid2b, n_out = w3.shape
    assert hid1 == hid1b and hid2 == hid2b and x.shape[-1] == f

    out_dtype = x.dtype if out_dtype is None else out_dtype
    lead_shape = x.shape[:-1]
    x2 = x.reshape(-1, f)
    m = x2.shape[0]

    gm = _sublane_granule(compute_dtype)
    ceiling = _vmem_ceiling_bytes()
    budget = int(ceiling * 0.9)
    dims = (f, hid1, hid2, n_out)

    mp = _round_up(m, gm)
    tm = min(_round_up(tm, gm), mp)
    # Shrink the row tile until the fused working set fits the VMEM budget.
    while tm > gm and _fused_vmem_estimate(tm, dims, compute_dtype, out_dtype) > budget:
        tm = max(gm, _round_up(tm // 2, gm))

    if _fused_vmem_estimate(tm, dims, compute_dtype, out_dtype) > budget:
        # Weights too large to keep resident -> per-layer tiled matmuls
        # (hidden activations round-trip HBM in compute_dtype only).
        h = linear_pallas(x2, w1, b1, activation="relu",
                          compute_dtype=compute_dtype, out_dtype=compute_dtype)
        h = linear_pallas(h, w2, b2, activation="relu",
                          compute_dtype=compute_dtype, out_dtype=compute_dtype)
        out = linear_pallas(h, w3, b3, activation=None,
                            compute_dtype=compute_dtype, out_dtype=out_dtype)
        return out.reshape(*lead_shape, n_out)

    # v7x megacore: make sure the 'parallel' M axis has >= 2 blocks when the
    # batch allows it (harmless on single-TC v5e/v6e: weights stay resident).
    if mp >= 2 * gm and _cdiv(mp, tm) < 2:
        tm = _round_up(_cdiv(mp, 2), gm)

    if mp != m:
        x2 = jnp.pad(x2, ((0, mp - m), (0, 0)))

    xc = x2.astype(compute_dtype)
    w1c = w1.astype(compute_dtype)
    w2c = w2.astype(compute_dtype)
    w3c = w3.astype(compute_dtype)
    b1f = b1.astype(jnp.float32).reshape(1, hid1)
    b2f = b2.astype(jnp.float32).reshape(1, hid2)
    b3f = b3.astype(jnp.float32).reshape(1, n_out)

    grid_m = _cdiv(mp, tm)

    out = pl.pallas_call(
        _fused_head_kernel,
        out_shape=jax.ShapeDtypeStruct((mp, n_out), out_dtype),
        grid=(grid_m,),
        in_specs=[
            pl.BlockSpec((tm, f), lambda i: (i, 0)),        # x row-tile (streamed)
            pl.BlockSpec((f, hid1), lambda i: (0, 0)),      # W1 (resident)
            pl.BlockSpec((1, hid1), lambda i: (0, 0)),      # b1 (resident, f32)
            pl.BlockSpec((hid1, hid2), lambda i: (0, 0)),   # W2 (resident)
            pl.BlockSpec((1, hid2), lambda i: (0, 0)),      # b2
            pl.BlockSpec((hid2, n_out), lambda i: (0, 0)),  # W3 (resident)
            pl.BlockSpec((1, n_out), lambda i: (0, 0)),     # b3
        ],
        out_specs=pl.BlockSpec((tm, n_out), lambda i: (i, 0)),
        scratch_shapes=[
            pltpu.VMEM((tm, hid1), compute_dtype),  # hidden activation 1
            pltpu.VMEM((tm, hid2), compute_dtype),  # hidden activation 2
        ],
        compiler_params=pltpu.CompilerParams(
            dimension_semantics=("parallel",),
            vmem_limit_bytes=ceiling,
        ),
    )(xc, w1c, b1f, w2c, b2f, w3c, b3f)

    if mp != m:
        out = out[:m]
    return out.reshape(*lead_shape, n_out)


# ---------------------------------------------------------------------------
# Fallback: standalone tiled linear layer (used when weights don't fit VMEM).
# ---------------------------------------------------------------------------
def _linear_kernel(x_ref, w_ref, b_ref, o_ref, acc_ref, *, activation):
    k = pl.program_id(2)

    @pl.when(k == 0)
    def _():
        acc_ref[...] = jnp.zeros_like(acc_ref)

    acc_ref[...] += jnp.dot(x_ref[...], w_ref[...],
                            preferred_element_type=jnp.float32)

    @pl.when(k == pl.num_programs(2) - 1)
    def _():
        out = acc_ref[...] + b_ref[...].astype(jnp.float32)
        if activation == "relu":  # static (trace-time) branch
            out = jnp.maximum(out, 0.0)
        o_ref[...] = out.astype(o_ref.dtype)


def linear_pallas(x, w, b, *, activation=None, compute_dtype=jnp.bfloat16,
                  out_dtype=None, tm=512, tn=512, tk=1024):
    """y = act(x @ w + b) via a tiled, f32-accumulating Pallas matmul.

    x: (M, K); w: (K, N) (transposed vs torch's (out, in)); b: (N,).
    Grid is (N-tiles, M-tiles, K-tiles): reduction last, N outermost so a
    weight stripe is DMA'd once per N tile when K collapses to one step.
    """
    m, k = x.shape
    kw, n = w.shape
    assert k == kw and b.shape == (n,)
    out_dtype = x.dtype if out_dtype is None else out_dtype

    gm = _sublane_granule(compute_dtype)
    mp = _round_up(m, gm)
    tm = min(_round_up(tm, gm), mp)
    tn = min(_round_up(tn, 128), _round_up(n, 128))
    tk = min(_round_up(tk, 128), _round_up(k, 128))
    kp = _round_up(k, tk)
    np_ = _round_up(n, tn)

    xc = x.astype(compute_dtype)
    wc = w.astype(compute_dtype)
    if (mp, kp) != (m, k):
        xc = jnp.pad(xc, ((0, mp - m), (0, kp - k)))
    if (kp, np_) != (k, n):
        wc = jnp.pad(wc, ((0, kp - k), (0, np_ - n)))
    bf = b.astype(jnp.float32)
    if np_ != n:
        bf = jnp.pad(bf, (0, np_ - n))
    b2d = bf.reshape(1, np_)

    grid = (np_ // tn, _cdiv(mp, tm), kp // tk)

    out = pl.pallas_call(
        functools.partial(_linear_kernel, activation=activation),
        out_shape=jax.ShapeDtypeStruct((mp, np_), out_dtype),
        grid=grid,
        in_specs=[
            pl.BlockSpec((tm, tk), lambda j, i, kk: (i, kk)),  # x tile
            pl.BlockSpec((tk, tn), lambda j, i, kk: (kk, j)),  # w tile
            pl.BlockSpec((1, tn), lambda j, i, kk: (0, j)),    # bias tile
        ],
        out_specs=pl.BlockSpec((tm, tn), lambda j, i, kk: (i, j)),
        scratch_shapes=[pltpu.VMEM((tm, tn), jnp.float32)],
        compiler_params=pltpu.CompilerParams(
            dimension_semantics=("parallel", "parallel", "arbitrary"),
            vmem_limit_bytes=_vmem_ceiling_bytes(),
        ),
    )(xc, wc, b2d)

    if (mp, np_) != (m, n):
        out = out[:m, :n]
    return out


def init_prediction_head_params(key, in_features, n_outputs, dtype=jnp.float32):
    """torch.nn.Linear-style uniform(-1/sqrt(fan_in), 1/sqrt(fan_in)) init."""
    dims = [
        (in_features, 2 * in_features),
        (2 * in_features, in_features),
        (in_features, n_outputs),
    ]
    keys = jax.random.split(key, 2 * len(dims))
    params = {}
    for idx, (fan_in, fan_out) in enumerate(dims):
        bound = 1.0 / (fan_in ** 0.5)
        params[f"w{idx + 1}"] = jax.random.uniform(
            keys[2 * idx], (fan_in, fan_out), dtype=dtype, minval=-bound, maxval=bound
        )
        params[f"b{idx + 1}"] = jax.random.uniform(
            keys[2 * idx + 1], (fan_out,), dtype=dtype, minval=-bound, maxval=bound
        )
    return params


if __name__ == "__main__":
    batch, in_features, n_outputs = 8, 32, 8

    key = jax.random.PRNGKey(0)
    kx, kp = jax.random.split(key)
    x = jax.random.normal(kx, (batch, in_features), dtype=jnp.float32)
    params = init_prediction_head_params(kp, in_features, n_outputs)

    # Pure-JAX reference with the same compute-dtype semantics (f32 accumulate,
    # f32 bias + ReLU, hidden activations stored in compute dtype).
    def ref_forward(xv, p, cdtype):
        def lin(v, wk, bk, act):
            y = jnp.dot(v.astype(cdtype), wk.astype(cdtype),
                        preferred_element_type=jnp.float32)
            y = y + bk.astype(jnp.float32)
            return jnp.maximum(y, 0.0) if act else y
        h = lin(xv, p["w1"], p["b1"], True).astype(cdtype)
        h = lin(h, p["w2"], p["b2"], True).astype(cdtype)
        return lin(h, p["w3"], p["b3"], False)

    # 1) Exact f32 path (matches the torch module bit-for-bit semantics).
    y_f32 = jax.block_until_ready(
        prediction_head_forward(x, params, compute_dtype=jnp.float32))
    assert y_f32.shape == (batch, n_outputs)
    assert jnp.allclose(y_f32, ref_forward(x, params, jnp.float32),
                        atol=1e-5, rtol=1e-5)

    # 2) Default production path: bf16 operands, f32 accumulation.
    y_bf16 = jax.block_until_ready(prediction_head_forward(x, params))
    assert y_bf16.shape == (batch, n_outputs)
    assert jnp.allclose(y_bf16, ref_forward(x, params, jnp.bfloat16),
                        atol=1e-2, rtol=1e-2)
    assert jnp.allclose(y_bf16, ref_forward(x, params, jnp.float32),
                        atol=5e-2, rtol=5e-2)

    # 3) Exercise the standalone tiled-linear fallback path as well.
    y_lin = jax.block_until_ready(
        linear_pallas(x, params["w1"], params["b1"], activation="relu",
                      compute_dtype=jnp.float32))
    assert jnp.allclose(
        y_lin, jnp.maximum(x @ params["w1"] + params["b1"], 0.0),
        atol=1e-5, rtol=1e-5)

    print("KERNEL_OK")
</pallas_src>

<mosaic_0001>
module attributes {stable_mosaic.version = 11 : i64} {
  func.func @_fused_head_kernel(%arg0: i32, %arg1: memref<8x32xf32, #tpu.memory_space<vmem>>, %arg2: memref<32x64xf32, #tpu.memory_space<vmem>>, %arg3: memref<1x64xf32, #tpu.memory_space<vmem>>, %arg4: memref<64x32xf32, #tpu.memory_space<vmem>>, %arg5: memref<1x32xf32, #tpu.memory_space<vmem>>, %arg6: memref<32x8xf32, #tpu.memory_space<vmem>>, %arg7: memref<1x8xf32, #tpu.memory_space<vmem>>, %arg8: memref<8x8xf32, #tpu.memory_space<vmem>>, %arg9: memref<8x64xf32, #tpu.memory_space<vmem>>, %arg10: memref<8x32xf32, #tpu.memory_space<vmem>>) attributes {dimension_semantics = [#tpu.dimension_semantics<parallel>], iteration_bounds = array<i64: 1>, scalar_prefetch = 0 : i64, scratch_operands = 2 : i64, tpu.core_type = #tpu.core_type<tc>, window_params = [{transform_indices = @transform_0, window_bounds = array<i64: 8, 32>}, {pipeline_mode = #tpu.pipeline_mode<synchronous>, transform_indices = @transform_1, window_bounds = array<i64: 32, 64>}, {pipeline_mode = #tpu.pipeline_mode<synchronous>, transform_indices = @transform_2, window_bounds = array<i64: 1, 64>}, {pipeline_mode = #tpu.pipeline_mode<synchronous>, transform_indices = @transform_3, window_bounds = array<i64: 64, 32>}, {pipeline_mode = #tpu.pipeline_mode<synchronous>, transform_indices = @transform_4, window_bounds = array<i64: 1, 32>}, {pipeline_mode = #tpu.pipeline_mode<synchronous>, transform_indices = @transform_5, window_bounds = array<i64: 32, 8>}, {pipeline_mode = #tpu.pipeline_mode<synchronous>, transform_indices = @transform_6, window_bounds = array<i64: 1, 8>}, {transform_indices = @transform_7, window_bounds = array<i64: 8, 8>}]} {
    %c0 = arith.constant 0 : index
    %c0_0 = arith.constant 0 : index
    %0 = vector.load %arg1[%c0, %c0_0] : memref<8x32xf32, #tpu.memory_space<vmem>>, vector<8x32xf32>
    %c0_1 = arith.constant 0 : index
    %c0_2 = arith.constant 0 : index
    %1 = vector.load %arg2[%c0_1, %c0_2] : memref<32x64xf32, #tpu.memory_space<vmem>>, vector<32x64xf32>
    %cst = arith.constant dense<0.000000e+00> : vector<8x64xf32>
    %2 = tpu.matmul %0, %1, %cst {dimension_numbers = #tpu.dot_dimension_numbers<[1], [0], [0], [1], [0, 0, 1, 1], [], []>} : vector<8x32xf32>, vector<32x64xf32>, vector<8x64xf32> -> vector<8x64xf32>
    %c0_3 = arith.constant 0 : index
    %c0_4 = arith.constant 0 : index
    %3 = vector.load %arg3[%c0_3, %c0_4] : memref<1x64xf32, #tpu.memory_space<vmem>>, vector<1x64xf32>
    %4 = vector.broadcast %3 : vector<1x64xf32> to vector<8x64xf32>
    %5 = arith.addf %2, %4 : vector<8x64xf32>
    %cst_5 = arith.constant 0.000000e+00 : f32
    %6 = vector.broadcast %cst_5 : f32 to vector<8x64xf32>
    %7 = arith.maximumf %5, %6 : vector<8x64xf32>
    %c0_6 = arith.constant 0 : index
    %c0_7 = arith.constant 0 : index
    %8 = vector.load %arg9[%c0_6, %c0_7] : memref<8x64xf32, #tpu.memory_space<vmem>>, vector<8x64xf32>
    tpu.vector_store %arg9[%c0_6, %c0_7], %7 {strides = array<i32>} : memref<8x64xf32, #tpu.memory_space<vmem>>, vector<8x64xf32>,
    %c0_8 = arith.constant 0 : index
    %c0_9 = arith.constant 0 : index
    %9 = vector.load %arg9[%c0_8, %c0_9] : memref<8x64xf32, #tpu.memory_space<vmem>>, vector<8x64xf32>
    %c0_10 = arith.constant 0 : index
    %c0_11 = arith.constant 0 : index
    %10 = vector.load %arg4[%c0_10, %c0_11] : memref<64x32xf32, #tpu.memory_space<vmem>>, vector<64x32xf32>
    %cst_12 = arith.constant dense<0.000000e+00> : vector<8x32xf32>
    %11 = tpu.matmul %9, %10, %cst_12 {dimension_numbers = #tpu.dot_dimension_numbers<[1], [0], [0], [1], [0, 0, 1, 1], [], []>} : vector<8x64xf32>, vector<64x32xf32>, vector<8x32xf32> -> vector<8x32xf32>
    %c0_13 = arith.constant 0 : index
    %c0_14 = arith.constant 0 : index
    %12 = vector.load %arg5[%c0_13, %c0_14] : memref<1x32xf32, #tpu.memory_space<vmem>>, vector<1x32xf32>
    %13 = vector.broadcast %12 : vector<1x32xf32> to vector<8x32xf32>
    %14 = arith.addf %11, %13 : vector<8x32xf32>
    %cst_15 = arith.constant 0.000000e+00 : f32
    %15 = vector.broadcast %cst_15 : f32 to vector<8x32xf32>
    %16 = arith.maximumf %14, %15 : vector<8x32xf32>
    %c0_16 = arith.constant 0 : index
    %c0_17 = arith.constant 0 : index
    %17 = vector.load %arg10[%c0_16, %c0_17] : memref<8x32xf32, #tpu.memory_space<vmem>>, vector<8x32xf32>
    tpu.vector_store %arg10[%c0_16, %c0_17], %16 {strides = array<i32>} : memref<8x32xf32, #tpu.memory_space<vmem>>, vector<8x32xf32>,
    %c0_18 = arith.constant 0 : index
    %c0_19 = arith.constant 0 : index
    %18 = vector.load %arg10[%c0_18, %c0_19] : memref<8x32xf32, #tpu.memory_space<vmem>>, vector<8x32xf32>
    %c0_20 = arith.constant 0 : index
    %c0_21 = arith.constant 0 : index
    %19 = vector.load %arg6[%c0_20, %c0_21] : memref<32x8xf32, #tpu.memory_space<vmem>>, vector<32x8xf32>
    %cst_22 = arith.constant dense<0.000000e+00> : vector<8x8xf32>
    %20 = tpu.matmul %18, %19, %cst_22 {dimension_numbers = #tpu.dot_dimension_numbers<[1], [0], [0], [1], [0, 0, 1, 1], [], []>} : vector<8x32xf32>, vector<32x8xf32>, vector<8x8xf32> -> vector<8x8xf32>
    %c0_23 = arith.constant 0 : index
    %c0_24 = arith.constant 0 : index
    %21 = vector.load %arg7[%c0_23, %c0_24] : memref<1x8xf32, #tpu.memory_space<vmem>>, vector<1x8xf32>
    %22 = vector.broadcast %21 : vector<1x8xf32> to vector<8x8xf32>
    %23 = arith.addf %20, %22 : vector<8x8xf32>
    %c0_25 = arith.constant 0 : index
    %c0_26 = arith.constant 0 : index
    %24 = vector.load %arg8[%c0_25, %c0_26] : memref<8x8xf32, #tpu.memory_space<vmem>>, vector<8x8xf32>
    tpu.vector_store %arg8[%c0_25, %c0_26], %23 {strides = array<i32>} : memref<8x8xf32, #tpu.memory_space<vmem>>, vector<8x8xf32>,
    return
  }
  func.func @transform_0(%arg0: i32) -> (i32, i32) {
    %c0_i32 = arith.constant 0 : i32
    %c0_i32_0 = arith.constant 0 : i32
    return %arg0, %c0_i32 : i32, i32
  }
  func.func @transform_1(%arg0: i32) -> (i32, i32) {
    %c0_i32 = arith.constant 0 : i32
    %c0_i32_0 = arith.constant 0 : i32
    %c0_i32_1 = arith.constant 0 : i32
    return %c0_i32, %c0_i32_0 : i32, i32
  }
  func.func @transform_2(%arg0: i32) -> (i32, i32) {
    %c0_i32 = arith.constant 0 : i32
    %c0_i32_0 = arith.constant 0 : i32
    %c0_i32_1 = arith.constant 0 : i32
    return %c0_i32, %c0_i32_0 : i32, i32
  }
  func.func @transform_3(%arg0: i32) -> (i32, i32) {
    %c0_i32 = arith.constant 0 : i32
    %c0_i32_0 = arith.constant 0 : i32
    %c0_i32_1 = arith.constant 0 : i32
    return %c0_i32, %c0_i32_0 : i32, i32
  }
  func.func @transform_4(%arg0: i32) -> (i32, i32) {
    %c0_i32 = arith.constant 0 : i32
    %c0_i32_0 = arith.constant 0 : i32
    %c0_i32_1 = arith.constant 0 : i32
    return %c0_i32, %c0_i32_0 : i32, i32
  }
  func.func @transform_5(%arg0: i32) -> (i32, i32) {
    %c0_i32 = arith.constant 0 : i32
    %c0_i32_0 = arith.constant 0 : i32
    %c0_i32_1 = arith.constant 0 : i32
    return %c0_i32, %c0_i32_0 : i32, i32
  }
  func.func @transform_6(%arg0: i32) -> (i32, i32) {
    %c0_i32 = arith.constant 0 : i32
    %c0_i32_0 = arith.constant 0 : i32
    %c0_i32_1 = arith.constant 0 : i32
    return %c0_i32, %c0_i32_0 : i32, i32
  }
  func.func @transform_7(%arg0: i32) -> (i32, i32) {
    %c0_i32 = arith.constant 0 : i32
    %c0_i32_0 = arith.constant 0 : i32
    return %arg0, %c0_i32 : i32, i32
  }
}

</mosaic_0001>

<bundles_post_ra>
// kernel: tpu_custom_call.1
= control target key start
LH: loop header
LB: loop body
LE: loop exit
PB: predicated region body
PF: predicated region fallthrough
CT: control target
= control target key end

     0   :  { %12 = vsyncpa [#allocation5], 0  ;;  %s852_s0 = inlined_call_operand.hbm [shape: f32[8,32], index: 0, kind: input, shape index: {}]   ;;  %s853_s1 = inlined_call_operand.hbm [shape: f32[32,64], index: 1, kind: input, shape index: {}]   ;;  %s854_s2 = inlined_call_operand.hbm [shape: f32[1,64], index: 2, kind: input, shape index: {}]   ;;  %s855_s3 = inlined_call_operand.hbm [shape: f32[64,32], index: 3, kind: input, shape index: {}]   ;;  %s856_s4 = inlined_call_operand.hbm [shape: f32[1,32], index: 4, kind: input, shape index: {}]   ;;  %s857_s5 = inlined_call_operand.hbm [shape: f32[32,8], index: 5, kind: input, shape index: {}]   ;;  %s858_s6 = inlined_call_operand.hbm [shape: f32[1,8], index: 6, kind: input, shape index: {}]   ;;  %s859_s7 = inlined_call_operand.hbm [shape: f32[8,8], index: 7, kind: output, shape index: {}]  }
   0x1   :  { %13 = vsyncpa [#allocation8], 0 }
   0x2   :  { %14 = vsyncpa [#allocation11], 0 }
   0x3   :  { %15 = vsyncpa [#allocation14], 0 }
   0x4   :  { %16 = vsyncpa [#allocation6], 0  ;;  %s688_s24 = smov [#allocation7]   ;;  %s502_s28 = scalar_lea.hbm %s853_s1, 512 }
   0x5   :  { %s32_s25 = sshll.u32 %s688_s24, 4  ;;  %p503_p0 = scmp.ne.s32.totalorder %s853_s1, %s502_s28  ;;  %s33_s25 = int_to_ptr.vmem [resolvable:$true] %s32_s25 }
   0x6   :  { %p506_p1 = scmp.lt.u32.totalorder %s502_s28, %s853_s1 }
   0x8   :  { %p508_p2 = pnand %p506_p1, %p503_p0 }
   0xa   :  { %511 = shalt.err (!%p508_p2)
}
   0xb   :  { %s512_s10 = scalar_lea.vmem %s33_s25, 512  ;;  %p517_p4 = scmp.lt.s32.totalorder %s33_s25, %s33_s25 }
   0xc   :  { %p513_p3 = scmp.ne.s32.totalorder %s33_s25, %s512_s10  ;;  %p518_p5 = scmp.lt.s32.totalorder %s512_s10, %s512_s10 }
   0xe   :  { %p519_p6 = por %p518_p5, %p517_p4 }
  0x10   :  { %p520_p7 = pnand %p519_p6, %p513_p3 }
  0x12   :  { %523 = shalt.err (!%p520_p7)
}
  0x13   :  { %s689_s11 = smov 128   ;;  %s690_s12 = smov 8  }
  0x14   :  { %38 = dma.hbm_to_vmem [thread:$0]  %s853_s1, 512, %s33_s25, [#allocation8], %s689_s11, %s689_s11, %s690_s12  }
  0x15   :  { %s691_s15 = smov [#allocation10]   ;;  %s692_s17 = smov [#allocation13]  }
  0x16   :  { %s54_s16 = sshll.u32 %s691_s15, 4  ;;  %s76_s18 = sshll.u32 %s692_s17, 4  ;;  %s55_s16 = int_to_ptr.vmem [resolvable:$true] %s54_s16  ;;  %s77_s18 = int_to_ptr.vmem [resolvable:$true] %s76_s18 }
  0x17   :  { %s524_s21 = scalar_lea.hbm %s855_s3, 1024 }
  0x18   :  { %p525_p8 = scmp.ne.s32.totalorder %s855_s3, %s524_s21  ;;  %p528_p9 = scmp.lt.u32.totalorder %s524_s21, %s855_s3 }
  0x1a   :  { %p530_p10 = pnand %p528_p9, %p525_p8 }
  0x1c   :  { %533 = shalt.err (!%p530_p10)
}
  0x1d   :  { %s534_s1 = scalar_lea.vmem %s55_s16, 1024  ;;  %p539_p12 = scmp.lt.s32.totalorder %s55_s16, %s55_s16 }
  0x1e   :  { %p535_p11 = scmp.ne.s32.totalorder %s55_s16, %s534_s1  ;;  %p540_p13 = scmp.lt.s32.totalorder %s534_s1, %s534_s1 }
  0x20   :  { %p541_p0 = por %p540_p13, %p539_p12 }
  0x22   :  { %p542_p1 = pnand %p541_p0, %p535_p11 }
  0x24   :  { %545 = shalt.err (!%p542_p1)
}
  0x25   :  { %60 = dma.hbm_to_vmem [thread:$0]  %s855_s3, 1024, %s55_s16, [#allocation11], %s689_s11, %s689_s11, %s690_s12  }
  0x26   :  { %s546_s30 = scalar_lea.hbm %s857_s5, 512 }
  0x27   :  { %p547_p2 = scmp.ne.s32.totalorder %s857_s5, %s546_s30  ;;  %p550_p3 = scmp.lt.u32.totalorder %s546_s30, %s857_s5 }
  0x29   :  { %p552_p4 = pnand %p550_p3, %p547_p2 }
  0x2b   :  { %555 = shalt.err (!%p552_p4)
}
  0x2c   :  { %s556_s14 = scalar_lea.vmem %s77_s18, 512  ;;  %p561_p6 = scmp.lt.s32.totalorder %s77_s18, %s77_s18 }
  0x2d   :  { %p557_p5 = scmp.ne.s32.totalorder %s77_s18, %s556_s14  ;;  %p562_p7 = scmp.lt.s32.totalorder %s556_s14, %s556_s14 }
  0x2f   :  { %p563_p8 = por %p562_p7, %p561_p6 }
  0x31   :  { %p564_p9 = pnand %p563_p8, %p557_p5 }
  0x33   :  { %567 = shalt.err (!%p564_p9)
}
  0x34   :  { %82 = dma.hbm_to_vmem [thread:$0]  %s857_s5, 512, %s77_s18, [#allocation14], %s689_s11, %s689_s11, %s690_s12  }
  0x35   :  { %s693_s16 = smov [#allocation4]   ;;  %s694_s19 = smov [#allocation9]  }
  0x36   :  { %s23_s17 = sshll.u32 %s693_s16, 4  ;;  %s45_s20 = sshll.u32 %s694_s19, 4  ;;  %s24_s17 = int_to_ptr.vmem [resolvable:$true] %s23_s17  ;;  %s46_s20 = int_to_ptr.vmem [resolvable:$true] %s45_s20 }
  0x37   :  { %s568_s23 = scalar_lea.hbm %s852_s0, 128 }
  0x38   :  { %p569_p10 = scmp.ne.s32.totalorder %s852_s0, %s568_s23  ;;  %p572_p11 = scmp.lt.u32.totalorder %s568_s23, %s852_s0 }
  0x3a   :  { %p574_p12 = pnand %p572_p11, %p569_p10 }
  0x3c   :  { %577 = shalt.err (!%p574_p12)
}
  0x3d   :  { %s578_s5 = scalar_lea.vmem %s24_s17, 128  ;;  %p583_p0 = scmp.lt.s32.totalorder %s24_s17, %s24_s17 }
  0x3e   :  { %p579_p13 = scmp.ne.s32.totalorder %s24_s17, %s578_s5  ;;  %p584_p1 = scmp.lt.s32.totalorder %s578_s5, %s578_s5 }
  0x40   :  { %p585_p2 = por %p584_p1, %p583_p0 }
  0x42   :  { %p586_p3 = pnand %p585_p2, %p579_p13 }
  0x44   :  { %589 = shalt.err (!%p586_p3)
}
  0x45   :  { %26 = dma.hbm_to_vmem [thread:$0]  %s852_s0, 128, %s24_s17, [#allocation5]  }
  0x46   :  { %s590_s28 = scalar_lea.hbm %s854_s2, 16 }
  0x47   :  { %p591_p4 = scmp.ne.s32.totalorder %s854_s2, %s590_s28  ;;  %p594_p5 = scmp.lt.u32.totalorder %s590_s28, %s854_s2 }
  0x49   :  { %p596_p6 = pnand %p594_p5, %p591_p4 }
  0x4b   :  { %599 = shalt.err (!%p596_p6)
}
  0x4c   :  { %s600_s10 = scalar_lea.vmem %s46_s20, 16  ;;  %s604_s13 = scalar_lea.vmem %s46_s20, 32 }
  0x4d   :  { %p601_p7 = scmp.ne.s32.totalorder %s46_s20, %s600_s10  ;;  %p605_p8 = scmp.lt.s32.totalorder %s46_s20, %s46_s20 }
  0x4e   :  { %p606_p9 = scmp.lt.s32.totalorder %s604_s13, %s600_s10 }
  0x50   :  { %p607_p10 = por %p606_p9, %p605_p8 }
  0x52   :  { %p608_p11 = pnand %p607_p10, %p601_p7 }
  0x54   :  { %611 = shalt.err (!%p608_p11)
}
  0x55   :  { %48 = dma.hbm_to_vmem [thread:$0]  %s854_s2, 16, %s46_s20, [#allocation8]  }
  0x56   :  { %s695_s3 = smov [#allocation12]   ;;  %s696_s16 = smov [#allocation15]  }
  0x57   :  { %s67_s15 = sshll.u32 %s695_s3, 4  ;;  %s89_s17 = sshll.u32 %s696_s16, 4  ;;  %s68_s15 = int_to_ptr.vmem [resolvable:$true] %s67_s15  ;;  %s90_s17 = int_to_ptr.vmem [resolvable:$true] %s89_s17 }
  0x58   :  { %s612_s22 = scalar_lea.hbm %s856_s4, 16 }
  0x59   :  { %p613_p12 = scmp.ne.s32.totalorder %s856_s4, %s612_s22  ;;  %p616_p13 = scmp.lt.u32.totalorder %s612_s22, %s856_s4 }
  0x5b   :  { %p618_p0 = pnand %p616_p13, %p613_p12 }
  0x5d   :  { %621 = shalt.err (!%p618_p0)
}
  0x5e   :  { %s622_s2 = scalar_lea.vmem %s68_s15, 16  ;;  %s626_s20 = scalar_lea.vmem %s68_s15, 32 }
  0x5f   :  { %p623_p1 = scmp.ne.s32.totalorder %s68_s15, %s622_s2  ;;  %p627_p2 = scmp.lt.s32.totalorder %s68_s15, %s68_s15 }
  0x60   :  { %p628_p3 = scmp.lt.s32.totalorder %s626_s20, %s622_s2 }
  0x62   :  { %p629_p4 = por %p628_p3, %p627_p2 }
  0x64   :  { %p630_p5 = pnand %p629_p4, %p623_p1 }
  0x66   :  { %633 = shalt.err (!%p630_p5)
}
  0x67   :  { %70 = dma.hbm_to_vmem [thread:$0]  %s856_s4, 16, %s68_s15, [#allocation11]  }
  0x68   :  { %s634_s18 = scalar_lea.hbm %s858_s6, 16 }
  0x69   :  { %p635_p6 = scmp.ne.s32.totalorder %s858_s6, %s634_s18  ;;  %p638_p7 = scmp.lt.u32.totalorder %s634_s18, %s858_s6 }
  0x6b   :  { %p640_p8 = pnand %p638_p7, %p635_p6 }
  0x6d   :  { %643 = shalt.err (!%p640_p8)
}
  0x6e   :  { %s644_s8 = scalar_lea.vmem %s90_s17, 16  ;;  %s648_s9 = scalar_lea.vmem %s90_s17, 32 }
  0x6f   :  { %p645_p9 = scmp.ne.s32.totalorder %s90_s17, %s644_s8  ;;  %p649_p10 = scmp.lt.s32.totalorder %s90_s17, %s90_s17 }
  0x70   :  { %p650_p11 = scmp.lt.s32.totalorder %s648_s9, %s644_s8 }
  0x72   :  { %p651_p12 = por %p650_p11, %p649_p10 }
  0x74   :  { %p652_p13 = pnand %p651_p12, %p645_p9 }
  0x76   :  { %655 = shalt.err (!%p652_p13)
}
  0x77   :  { %92 = dma.hbm_to_vmem [thread:$0]  %s858_s6, 16, %s90_s17, [#allocation14]  }
  0x78   :  { %678 = dma.done.wait [#allocation5], 128  }
  0x79   :  { %679 = vsyncadd [#allocation5], 4294967168 }
  0x7a   :  { %680 = dma.done.wait [#allocation8], 528  }
  0x7b   :  { %681 = vsyncadd [#allocation8], 4294966768 }
  0x7c   :  { %682 = dma.done.wait [#allocation11], 1040  }
  0x7d   :  { %683 = vsyncadd [#allocation11], 4294966256 }
  0x7e   :  { %684 = dma.done.wait [#allocation14], 528  }
  0x7f   :  { %685 = vsyncadd [#allocation14], 4294966768  ;;  %v697_v0 = vmov 0.0|0.0   ;;  %vm698_vm0 = vmmov 0   ;;  %v699_v1 = vmov 0.0   ;;  %v115_v2 = vld [vmem:[#allocation7] sm:$0xff] }
  0x80   :  { %465 = vmatprep.subr.bf16.mxu0 %v697_v0  ;;  %432 = vmatprep.mubr.msk.f32.mxu0 %vm698_vm0, %v699_v1  ;;  %v116_v3 = vld [vmem:[#allocation7 + $0x8] sm:$0xff]  ;;  %v117_v4 = vld [vmem:[#allocation7 + $0x10] sm:$0xff]  ;;  %v118_v6 = vld [vmem:[#allocation7 + $0x18] sm:$0xff]  ;;  %vm126_vm1 = vcmask 261120   ;;  %vm201_vm2 = vcmask 523264   ;;  %s700_s6 = smov [#allocation16]  }
  0x81   :  { %471 = vmatprep.subr.bf16.mxu1 %v697_v0  ;;  %451 = vmatprep.mubr.msk.f32.mxu1 %vm698_vm0, %v699_v1  ;;  %v466_v5 = vpack.c.bf16 %v116_v3, %v115_v2  ;;  %v204_v7 = vld [vmem:[#allocation10] sm:$0xff]  ;;  %v205_v8 = vld [vmem:[#allocation10 + $0x8] sm:$0xff]  ;;  %v469_v9 = vpack.c.bf16 %v118_v6, %v117_v4  ;;  %v114_v11 = vld [vmem:[#allocation4] sm:$0xff]  ;;  %s387_s13 = sshll.u32 %s700_s6, 4  ;;  %vm379_vm3 = vcmask 64512   ;;  %s388_s13 = int_to_ptr.vmem [resolvable:$true] %s387_s13 }
  0x82   :  { %v472_v10 = vpack.c.bf16 %v205_v8, %v204_v7  ;;  %v206_v12 = vld [vmem:[#allocation10 + $0x10] sm:$0xff]  ;;  %v207_v13 = vld [vmem:[#allocation10 + $0x18] sm:$0xff]  ;;  %v208_v15 = vld [vmem:[#allocation10 + $0x20] sm:$0xff]  ;;  %s656_s0 = scalar_lea.vmem %s388_s13, 128  ;;  %p661_p1 = scmp.lt.s32.totalorder %s388_s13, %s388_s13 }
  0x83   :  { %467 = vmatpush3.bf16.msra.mxu0 %v466_v5  ;;  %v475_v14 = vpack.c.bf16 %v207_v13, %v206_v12  ;;  %v209_v16 = vld [vmem:[#allocation10 + $0x28] sm:$0xff]  ;;  %v210_v17 = vld [vmem:[#allocation10 + $0x30] sm:$0xff]  ;;  %v211_v19 = vld [vmem:[#allocation10 + $0x38] sm:$0xff]  ;;  %p657_p0 = scmp.ne.s32.totalorder %s388_s13, %s656_s0  ;;  %p662_p2 = scmp.lt.s32.totalorder %s656_s0, %s656_s0 }
  0x84   :  { %468 = vmatprep.subr.bf16.mxu0 %v697_v0  ;;  %473 = vmatpush3.bf16.msra.mxu1 %v472_v10  ;;  %v478_v18 = vpack.c.bf16 %v209_v16, %v208_v15  ;;  %v481_v20 = vpack.c.bf16 %v211_v19, %v210_v17  ;;  %v399_v21 = vld [vmem:[#allocation9] ss:$0 sm:$0xff]  ;;  %v295_v27 = vld [vmem:[#allocation13] sm:$0xff]  ;;  %v296_v28 = vld [vmem:[#allocation13 + $0x8] sm:$0xff] }
  0x85   :  { %474 = vmatprep.subr.bf16.mxu1 %v697_v0  ;;  %v484_v29 = vpack.c.bf16 %v296_v28, %v295_v27  ;;  %v297_v30 = vld [vmem:[#allocation13 + $0x10] sm:$0xff]  ;;  %v298_v31 = vld [vmem:[#allocation13 + $0x18] sm:$0xff]  ;;  %v403_v39 = vld [vmem:[#allocation15] ss:$0 sm:$0xff]  ;;  %p663_p3 = por %p662_p2, %p661_p1 }
  0x86   :  { %v487_v32 = vpack.c.bf16 %v298_v31, %v297_v30  ;;  %v401_v33 = vld [vmem:[#allocation12] ss:$0 sm:$0xff] }
  0x87   :  { %470 = vmatpush3.bf16.msra.mxu0 %v469_v9  ;;  %p664_p4 = pnand %p663_p3, %p657_p0 }
  0x88   :  { %483 = vmatprep.subr.bf16.mxu0 %v697_v0  ;;  %476 = vmatpush3.bf16.msra.mxu1 %v475_v14 }
  0x89   :  { %477 = vmatprep.subr.bf16.mxu1 %v697_v0 }
  0x8a   :  { %433 = vmatmul.mubr.msk.f32.vlgmr.msra.gmra.mrb[0].mxu0 %vm126_vm1, %v114_v11 }
  0x8b   :  { %462 = vmatprep.mubr.msk.f32.mxu0 %vm698_vm0, %v699_v1  ;;  %485 = vmatpush3.bf16.msra.mxu0 %v484_v29 }
  0x8c   :  { %479 = vmatpush3.bf16.msra.mxu1 %v478_v18  ;;  %486 = vmatprep.subr.bf16.mxu0 %v697_v0 }
  0x8d   :  { %480 = vmatprep.subr.bf16.mxu1 %v697_v0 }
  0x8f   :  { %488 = vmatpush3.bf16.msra.mxu0 %v487_v32 }
  0x90   :  { %482 = vmatpush3.bf16.msra.mxu1 %v481_v20 }
 0x15d   :  { %v196_v22 = vpop.f32.mrb[0].mxu0 }
 0x15e   :  { %v197_v23 = vadd.f32 %v399_v21, %v196_v22  ;;  %v434_v24 = vpop.f32.mrb[1].mxu0 }
 0x160   :  { %v200_v25 = vmax.f32 %v197_v23, 0.0 }
 0x162   :  { %202 = vst.msk [vmem:[#allocation2] sm:$0xff] %vm201_vm2, %v200_v25 }
 0x169   :  { %v203_v26 = vld [vmem:[#allocation2] sm:$0xff] }
 0x16a   :  { %452 = vmatmul.mubr.msk.f32.vlgmr.msra.gmra.mrb[0].mxu1 %vm201_vm2, %v203_v26 }
 0x23d   :  { %v288_v34 = vpop.f32.mrb[0].mxu1 }
 0x23e   :  { %v289_v35 = vadd.f32 %v401_v33, %v288_v34  ;;  %v453_v36 = vpop.f32.mrb[1].mxu1 }
 0x240   :  { %v292_v37 = vmax.f32 %v289_v35, 0.0 }
 0x242   :  { %293 = vst.msk [vmem:[#allocation3] sm:$0xff] %vm126_vm1, %v292_v37 }
 0x249   :  { %v294_v38 = vld [vmem:[#allocation3] sm:$0xff] }
 0x24a   :  { %463 = vmatmul.mubr.msk.f32.vlgmr.msra.gmra.mrb[2].mxu0 %vm126_vm1, %v294_v38 }
 0x31d   :  { %v375_v40 = vpop.f32.mrb[2].mxu0 }
 0x31e   :  { %v376_v41 = vadd.f32 %v403_v39, %v375_v40  ;;  %v464_v42 = vpop.f32.mrb[3].mxu0 }
 0x320   :  { %380 = vst.msk [vmem:[#allocation16] sm:$0xff] %vm379_vm3, %v376_v41 }
 0x321   :  { %667 = shalt.err (!%p664_p4)
}
 0x322   :  { %s668_s15 = scalar_lea.hbm %s859_s7, 128 }
 0x323   :  { %p669_p5 = scmp.ne.s32.totalorder %s859_s7, %s668_s15  ;;  %p672_p6 = scmp.lt.u32.totalorder %s668_s15, %s859_s7 }
 0x325   :  { %p674_p7 = pnand %p672_p6, %p669_p5 }
 0x327   :  { %677 = shalt.err (!%p674_p7)
}
 0x328   :  { %390 = dma.vmem_to_hbm [thread:$0]  %s388_s13, 128, %s859_s7, [#allocation6]  }
 0x329   :  { %686 = dma.done.wait [#allocation6], 128  }
 0x32a   :  { %687 = vsyncadd [#allocation6], 4294967168 }
 0x32b   :  { %394 = vsyncpa [#allocation5], 1 }
 0x32c   :  { %395 = vsyncpa [#allocation8], 1 }
 0x32d   :  { %396 = vsyncpa [#allocation11], 1 }
 0x32e   :  { %397 = vsyncpa [#allocation14], 1 }
 0x32f   :  { %398 = vsyncpa [#allocation6], 1 }

</bundles_post_ra>
